<compile_context>
chip_gen: v7x
topology: tpu7x:2x2x1
jax: 0.10.0
libtpu: 0.0.40
codegen_flags: <defaults>
</compile_context>

<pallas_src>
import functools
import math

import jax
import jax.numpy as jnp
from jax.experimental import pallas as pl
from jax.experimental.pallas import tpu as pltpu


def _round_up(n, m):
    return ((n + m - 1) // m) * m


# ----------------------------------------------------------------------------
# Kernel: fused Linear -> SiLU -> Linear -> SiLU -> Linear on one row tile
# ----------------------------------------------------------------------------
def _mlp_kernel(x_ref, w1_ref, b1_ref, w2_ref, b2_ref, w3_ref, b3_ref, o_ref):
    cdt = w1_ref.dtype                     # matmul operand dtype (bf16 or f32)
    x = x_ref[...].astype(cdt)                                   # (tm, d_in)
    h = jnp.dot(x, w1_ref[...], preferred_element_type=jnp.float32) + b1_ref[...]
    h = jax.nn.silu(h).astype(cdt)
    h = jnp.dot(h, w2_ref[...], preferred_element_type=jnp.float32) + b2_ref[...]
    h = jax.nn.silu(h).astype(cdt)
    y = jnp.dot(h, w3_ref[...], preferred_element_type=jnp.float32) + b3_ref[...]
    o_ref[...] = y.astype(o_ref.dtype)                           # (tm, d_out)


# ----------------------------------------------------------------------------
# pallas_call wrapper
# ----------------------------------------------------------------------------
@functools.partial(jax.jit, static_argnames=("tm", "out_dtype"))
def _mlp_pallas(x2, w1, b1, w2, b2, w3, b3, *, tm, out_dtype):
    M, d_in = x2.shape
    d_out = w1.shape[1]
    grid = (pl.cdiv(M, tm),)               # ragged last block handled by Pallas

    # Weights / biases: constant block index -> keep resident, single-buffered.
    def resident(shape):
        return pl.BlockSpec(shape, lambda i: (0,) * len(shape),
                            pipeline_mode=pl.Buffered(1))

    # VMEM budget: weights (1 buffer) + biases + double-buffered x/out tiles
    # + ~4 live (tm, d_out) f32 intermediates, with 25% headroom.
    w_bytes = (d_in * d_out + 2 * d_out * d_out) * w1.dtype.itemsize
    b_bytes = 3 * 8 * _round_up(d_out, 128) * 4
    x_bytes = 2 * tm * max(_round_up(d_in, 128), d_in) * x2.dtype.itemsize
    o_bytes = 2 * tm * _round_up(d_out, 128) * jnp.dtype(out_dtype).itemsize
    i_bytes = 4 * tm * _round_up(d_out, 128) * 4
    est = int((w_bytes + b_bytes + x_bytes + o_bytes + i_bytes) * 1.25) + (2 << 20)
    vmem_limit = int(min(max(est, 32 << 20), 60 << 20))

    cost = pl.CostEstimate(
        flops=2 * M * (d_in * d_out + 2 * d_out * d_out),
        transcendentals=2 * M * d_out,
        bytes_accessed=(M * d_in * x2.dtype.itemsize
                        + M * d_out * jnp.dtype(out_dtype).itemsize
                        + w_bytes + 3 * d_out * 4),
    )

    return pl.pallas_call(
        _mlp_kernel,
        out_shape=jax.ShapeDtypeStruct((M, d_out), out_dtype),
        grid_spec=pltpu.PrefetchScalarGridSpec(
            num_scalar_prefetch=0,
            grid=grid,
            in_specs=[
                pl.BlockSpec((tm, d_in), lambda i: (i, 0)),    # x rows (streamed)
                resident((d_in, d_out)), resident((1, d_out)),  # w1, b1
                resident((d_out, d_out)), resident((1, d_out)),  # w2, b2
                resident((d_out, d_out)), resident((1, d_out)),  # w3, b3
            ],
            out_specs=pl.BlockSpec((tm, d_out), lambda i: (i, 0)),
        ),
        compiler_params=pltpu.CompilerParams(
            dimension_semantics=("parallel",),
            vmem_limit_bytes=vmem_limit,
        ),
        cost_estimate=cost,
    )(x2, w1, b1, w2, b2, w3, b3)


def mlp_forward(x_a, params, tm=512, compute_dtype=jnp.bfloat16, out_dtype=None):
    """x_a: (..., dim_in) -> (..., dim_out).

    tm: row tile (rounded to a multiple of 16).
    compute_dtype: matmul operand dtype (bf16 default; accumulation stays f32).
    out_dtype: output dtype (default: same as x_a, i.e. f32 like the PyTorch module).
    """
    w1, b1, w2, b2, w3, b3 = params
    d_in = x_a.shape[-1]
    d_out = w1.shape[1]
    lead = x_a.shape[:-1]
    M = int(math.prod(lead)) if lead else 1
    if out_dtype is None:
        out_dtype = x_a.dtype

    # Row tile: clamp for tiny inputs; for large M ensure >= 2 grid steps so a
    # v7x megacore's second TensorCore is not idle; multiples of 16 for bf16.
    tm_eff = min(int(tm), _round_up(max(M, 1), 16))
    if M >= 512 and pl.cdiv(M, tm_eff) < 2:
        tm_eff = _round_up(pl.cdiv(M, 2), 16)
    tm_eff = max(16, (tm_eff // 16) * 16)

    x2 = x_a.reshape(M, d_in)            # x stays in its HBM dtype; cast in-kernel
    w1c, w2c, w3c = (w.astype(compute_dtype) for w in (w1, w2, w3))
    b1f, b2f, b3f = (b.astype(jnp.float32) for b in (b1, b2, b3))

    out = _mlp_pallas(x2, w1c, b1f, w2c, b2f, w3c, b3f,
                      tm=tm_eff, out_dtype=jnp.dtype(out_dtype))
    return out.reshape(*lead, d_out)


# ----------------------------------------------------------------------------
# Deterministic parameters (stored as (in, out); PyTorch Linear is x @ W.T + b)
# ----------------------------------------------------------------------------
def make_params(key, dim_in, dim_out):
    ks = jax.random.split(key, 6)
    scale = 0.1
    w1 = scale * jax.random.normal(ks[0], (dim_in, dim_out), jnp.float32)
    b1 = scale * jax.random.normal(ks[1], (1, dim_out), jnp.float32)
    w2 = scale * jax.random.normal(ks[2], (dim_out, dim_out), jnp.float32)
    b2 = scale * jax.random.normal(ks[3], (1, dim_out), jnp.float32)
    w3 = scale * jax.random.normal(ks[4], (dim_out, dim_out), jnp.float32)
    b3 = scale * jax.random.normal(ks[5], (1, dim_out), jnp.float32)
    return (w1, b1, w2, b2, w3, b3)


# ----------------------------------------------------------------------------
# Pure-JAX reference (mirrors the PyTorch forward) for verification
# ----------------------------------------------------------------------------
def reference_forward(x_a, params):
    w1, b1, w2, b2, w3, b3 = params
    h = jax.nn.silu(x_a @ w1 + b1[0])
    h = jax.nn.silu(h @ w2 + b2[0])
    return h @ w3 + b3[0]


if __name__ == "__main__":
    key = jax.random.PRNGKey(0)
    k_x, k_p, k_x2 = jax.random.split(key, 3)

    B, A = 2, 8
    dim_in, dim_out = 64, 128
    params = make_params(k_p, dim_in, dim_out)

    # 1) Default fast path: bf16 matmul operands, f32 accumulation / output.
    x_a = jax.random.normal(k_x, (B, A, dim_in), jnp.float32)
    out = mlp_forward(x_a, params)
    out = jax.block_until_ready(out)
    ref = reference_forward(x_a, params)
    assert out.shape == (B, A, dim_out), f"bad shape {out.shape}"
    assert jnp.allclose(out, ref, atol=5e-2, rtol=5e-2), "bf16 MLP output mismatch"

    # 2) Exactness check: f32 operands + a ragged row count (M=21, tm=16)
    #    exercises the pad-free partial-last-block path.
    x_b = jax.random.normal(k_x2, (3, 7, dim_in), jnp.float32)
    out2 = mlp_forward(x_b, params, tm=16, compute_dtype=jnp.float32)
    out2 = jax.block_until_ready(out2)
    ref2 = reference_forward(x_b, params)
    assert out2.shape == (3, 7, dim_out), f"bad shape {out2.shape}"
    assert jnp.allclose(out2, ref2, atol=1e-4, rtol=1e-4), "f32 MLP output mismatch"

    print("KERNEL_OK")
</pallas_src>

<mosaic_0001>
module attributes {stable_mosaic.version = 11 : i64} {
  func.func @_mlp_kernel(%arg0: i32, %arg1: memref<16x64xf32, #tpu.memory_space<vmem>>, %arg2: memref<64x128xbf16, #tpu.memory_space<vmem>>, %arg3: memref<1x128xf32, #tpu.memory_space<vmem>>, %arg4: memref<128x128xbf16, #tpu.memory_space<vmem>>, %arg5: memref<1x128xf32, #tpu.memory_space<vmem>>, %arg6: memref<128x128xbf16, #tpu.memory_space<vmem>>, %arg7: memref<1x128xf32, #tpu.memory_space<vmem>>, %arg8: memref<16x128xf32, #tpu.memory_space<vmem>>) attributes {dimension_semantics = [#tpu.dimension_semantics<parallel>], iteration_bounds = array<i64: 1>, scalar_prefetch = 0 : i64, scratch_operands = 0 : i64, tpu.core_type = #tpu.core_type<tc>, window_params = [{transform_indices = @transform_0, window_bounds = array<i64: 16, 64>}, {pipeline_mode = #tpu.pipeline_mode<synchronous>, transform_indices = @transform_1, window_bounds = array<i64: 64, 128>}, {pipeline_mode = #tpu.pipeline_mode<synchronous>, transform_indices = @transform_2, window_bounds = array<i64: 1, 128>}, {pipeline_mode = #tpu.pipeline_mode<synchronous>, transform_indices = @transform_3, window_bounds = array<i64: 128, 128>}, {pipeline_mode = #tpu.pipeline_mode<synchronous>, transform_indices = @transform_4, window_bounds = array<i64: 1, 128>}, {pipeline_mode = #tpu.pipeline_mode<synchronous>, transform_indices = @transform_5, window_bounds = array<i64: 128, 128>}, {pipeline_mode = #tpu.pipeline_mode<synchronous>, transform_indices = @transform_6, window_bounds = array<i64: 1, 128>}, {transform_indices = @transform_7, window_bounds = array<i64: 16, 128>}]} {
    %c0 = arith.constant 0 : index
    %c0_0 = arith.constant 0 : index
    %0 = vector.load %arg1[%c0, %c0_0] : memref<16x64xf32, #tpu.memory_space<vmem>>, vector<16x64xf32>
    %1 = arith.truncf %0 : vector<16x64xf32> to vector<16x64xbf16>
    %c0_1 = arith.constant 0 : index
    %c0_2 = arith.constant 0 : index
    %2 = vector.load %arg2[%c0_1, %c0_2] : memref<64x128xbf16, #tpu.memory_space<vmem>>, vector<64x128xbf16>
    %cst = arith.constant dense<0.000000e+00> : vector<16x128xf32>
    %3 = tpu.matmul %1, %2, %cst {dimension_numbers = #tpu.dot_dimension_numbers<[1], [0], [0], [1], [0, 0, 1, 1], [], []>} : vector<16x64xbf16>, vector<64x128xbf16>, vector<16x128xf32> -> vector<16x128xf32>
    %c0_3 = arith.constant 0 : index
    %c0_4 = arith.constant 0 : index
    %4 = vector.load %arg3[%c0_3, %c0_4] : memref<1x128xf32, #tpu.memory_space<vmem>>, vector<1x128xf32>
    %5 = vector.broadcast %4 : vector<1x128xf32> to vector<16x128xf32>
    %6 = arith.addf %3, %5 : vector<16x128xf32>
    %7 = arith.negf %6 : vector<16x128xf32>
    %8 = math.exp %7 : vector<16x128xf32>
    %cst_5 = arith.constant 1.000000e+00 : f32
    %9 = vector.broadcast %cst_5 : f32 to vector<16x128xf32>
    %10 = arith.addf %9, %8 : vector<16x128xf32>
    %11 = arith.divf %9, %10 : vector<16x128xf32>
    %12 = arith.mulf %6, %11 : vector<16x128xf32>
    %13 = arith.truncf %12 : vector<16x128xf32> to vector<16x128xbf16>
    %c0_6 = arith.constant 0 : index
    %c0_7 = arith.constant 0 : index
    %14 = vector.load %arg4[%c0_6, %c0_7] : memref<128x128xbf16, #tpu.memory_space<vmem>>, vector<128x128xbf16>
    %cst_8 = arith.constant dense<0.000000e+00> : vector<16x128xf32>
    %15 = tpu.matmul %13, %14, %cst_8 {dimension_numbers = #tpu.dot_dimension_numbers<[1], [0], [0], [1], [0, 0, 1, 1], [], []>} : vector<16x128xbf16>, vector<128x128xbf16>, vector<16x128xf32> -> vector<16x128xf32>
    %c0_9 = arith.constant 0 : index
    %c0_10 = arith.constant 0 : index
    %16 = vector.load %arg5[%c0_9, %c0_10] : memref<1x128xf32, #tpu.memory_space<vmem>>, vector<1x128xf32>
    %17 = vector.broadcast %16 : vector<1x128xf32> to vector<16x128xf32>
    %18 = arith.addf %15, %17 : vector<16x128xf32>
    %19 = arith.negf %18 : vector<16x128xf32>
    %20 = math.exp %19 : vector<16x128xf32>
    %cst_11 = arith.constant 1.000000e+00 : f32
    %21 = vector.broadcast %cst_11 : f32 to vector<16x128xf32>
    %22 = arith.addf %21, %20 : vector<16x128xf32>
    %23 = arith.divf %21, %22 : vector<16x128xf32>
    %24 = arith.mulf %18, %23 : vector<16x128xf32>
    %25 = arith.truncf %24 : vector<16x128xf32> to vector<16x128xbf16>
    %c0_12 = arith.constant 0 : index
    %c0_13 = arith.constant 0 : index
    %26 = vector.load %arg6[%c0_12, %c0_13] : memref<128x128xbf16, #tpu.memory_space<vmem>>, vector<128x128xbf16>
    %cst_14 = arith.constant dense<0.000000e+00> : vector<16x128xf32>
    %27 = tpu.matmul %25, %26, %cst_14 {dimension_numbers = #tpu.dot_dimension_numbers<[1], [0], [0], [1], [0, 0, 1, 1], [], []>} : vector<16x128xbf16>, vector<128x128xbf16>, vector<16x128xf32> -> vector<16x128xf32>
    %c0_15 = arith.constant 0 : index
    %c0_16 = arith.constant 0 : index
    %28 = vector.load %arg7[%c0_15, %c0_16] : memref<1x128xf32, #tpu.memory_space<vmem>>, vector<1x128xf32>
    %29 = vector.broadcast %28 : vector<1x128xf32> to vector<16x128xf32>
    %30 = arith.addf %27, %29 : vector<16x128xf32>
    %c0_17 = arith.constant 0 : index
    %c0_18 = arith.constant 0 : index
    %31 = vector.load %arg8[%c0_17, %c0_18] : memref<16x128xf32, #tpu.memory_space<vmem>>, vector<16x128xf32>
    tpu.vector_store %arg8[%c0_17, %c0_18], %30 {strides = array<i32>} : memref<16x128xf32, #tpu.memory_space<vmem>>, vector<16x128xf32>,
    return
  }
  func.func @transform_0(%arg0: i32) -> (i32, i32) {
    %c0_i32 = arith.constant 0 : i32
    %c0_i32_0 = arith.constant 0 : i32
    return %arg0, %c0_i32 : i32, i32
  }
  func.func @transform_1(%arg0: i32) -> (i32, i32) {
    %c0_i32 = arith.constant 0 : i32
    %c0_i32_0 = arith.constant 0 : i32
    %c0_i32_1 = arith.constant 0 : i32
    return %c0_i32, %c0_i32_0 : i32, i32
  }
  func.func @transform_2(%arg0: i32) -> (i32, i32) {
    %c0_i32 = arith.constant 0 : i32
    %c0_i32_0 = arith.constant 0 : i32
    %c0_i32_1 = arith.constant 0 : i32
    return %c0_i32, %c0_i32_0 : i32, i32
  }
  func.func @transform_3(%arg0: i32) -> (i32, i32) {
    %c0_i32 = arith.constant 0 : i32
    %c0_i32_0 = arith.constant 0 : i32
    %c0_i32_1 = arith.constant 0 : i32
    return %c0_i32, %c0_i32_0 : i32, i32
  }
  func.func @transform_4(%arg0: i32) -> (i32, i32) {
    %c0_i32 = arith.constant 0 : i32
    %c0_i32_0 = arith.constant 0 : i32
    %c0_i32_1 = arith.constant 0 : i32
    return %c0_i32, %c0_i32_0 : i32, i32
  }
  func.func @transform_5(%arg0: i32) -> (i32, i32) {
    %c0_i32 = arith.constant 0 : i32
    %c0_i32_0 = arith.constant 0 : i32
    %c0_i32_1 = arith.constant 0 : i32
    return %c0_i32, %c0_i32_0 : i32, i32
  }
  func.func @transform_6(%arg0: i32) -> (i32, i32) {
    %c0_i32 = arith.constant 0 : i32
    %c0_i32_0 = arith.constant 0 : i32
    %c0_i32_1 = arith.constant 0 : i32
    return %c0_i32, %c0_i32_0 : i32, i32
  }
  func.func @transform_7(%arg0: i32) -> (i32, i32) {
    %c0_i32 = arith.constant 0 : i32
    %c0_i32_0 = arith.constant 0 : i32
    return %arg0, %c0_i32 : i32, i32
  }
}

</mosaic_0001>

<bundles_post_ra>
// kernel: _mlp_pallas.1
= control target key start
LH: loop header
LB: loop body
LE: loop exit
PB: predicated region body
PF: predicated region fallthrough
CT: control target
= control target key end

     0   :  { %12 = vsyncpa [#allocation3], 0  ;;  %s881_s0 = inlined_call_operand.hbm [shape: f32[16,64], index: 0, kind: input, shape index: {}]   ;;  %s882_s1 = inlined_call_operand.hbm [shape: bf16[64,128], index: 1, kind: input, shape index: {}]   ;;  %s883_s2 = inlined_call_operand.vmem [shape: f32[1,128], index: 2, kind: input, shape index: {}]   ;;  %s884_s3 = inlined_call_operand.hbm [shape: bf16[128,128], index: 3, kind: input, shape index: {}]   ;;  %s885_s4 = inlined_call_operand.vmem [shape: f32[1,128], index: 4, kind: input, shape index: {}]   ;;  %s886_s5 = inlined_call_operand.hbm [shape: bf16[128,128], index: 5, kind: input, shape index: {}]   ;;  %s887_s6 = inlined_call_operand.vmem [shape: f32[1,128], index: 6, kind: input, shape index: {}]   ;;  %s888_s7 = inlined_call_operand.hbm [shape: f32[16,128], index: 7, kind: output, shape index: {}]  }
   0x1   :  { %13 = vsyncpa [#allocation6], 0 }
   0x2   :  { %14 = vsyncpa [#allocation9], 0 }
   0x3   :  { %15 = vsyncpa [#allocation4], 0  ;;  %s713_s24 = smov [#allocation5]   ;;  %s595_s28 = scalar_lea.hbm %s882_s1, 512 }
   0x4   :  { %s33_s25 = sshll.u32 %s713_s24, 4  ;;  %p596_p0 = scmp.ne.s32.totalorder %s882_s1, %s595_s28  ;;  %s34_s25 = int_to_ptr.vmem [resolvable:$true] %s33_s25 }
   0x5   :  { %p599_p1 = scmp.lt.u32.totalorder %s595_s28, %s882_s1 }
   0x7   :  { %p601_p2 = pnand %p599_p1, %p596_p0 }
   0x9   :  { %604 = shalt.err (!%p601_p2)
}
   0xa   :  { %s605_s10 = scalar_lea.vmem %s34_s25, 512  ;;  %p610_p4 = scmp.lt.s32.totalorder %s34_s25, %s34_s25 }
   0xb   :  { %p606_p3 = scmp.ne.s32.totalorder %s34_s25, %s605_s10  ;;  %p611_p5 = scmp.lt.s32.totalorder %s605_s10, %s605_s10 }
   0xd   :  { %p612_p6 = por %p611_p5, %p610_p4 }
   0xf   :  { %p613_p7 = pnand %p612_p6, %p606_p3 }
  0x11   :  { %616 = shalt.err (!%p613_p7)
}
  0x12   :  { %s714_s11 = smov 64   ;;  %s715_s12 = smov 4  }
  0x13   :  { %39 = dma.hbm_to_vmem [thread:$0]  %s882_s1, 512, %s34_s25, [#allocation6], %s714_s11, %s714_s11, %s715_s12  }
  0x14   :  { %s716_s15 = smov [#allocation2]   ;;  %s617_s19 = scalar_lea.hbm %s881_s0, 256 }
  0x15   :  { %s21_s16 = sshll.u32 %s716_s15, 4  ;;  %p618_p8 = scmp.ne.s32.totalorder %s881_s0, %s617_s19  ;;  %s22_s16 = int_to_ptr.vmem [resolvable:$true] %s21_s16 }
  0x16   :  { %p621_p9 = scmp.lt.u32.totalorder %s617_s19, %s881_s0 }
  0x18   :  { %p623_p10 = pnand %p621_p9, %p618_p8 }
  0x1a   :  { %626 = shalt.err (!%p623_p10)
}
  0x1b   :  { %s627_s24 = scalar_lea.vmem %s22_s16, 256  ;;  %p632_p12 = scmp.lt.s32.totalorder %s22_s16, %s22_s16 }
  0x1c   :  { %p628_p11 = scmp.ne.s32.totalorder %s22_s16, %s627_s24  ;;  %p633_p13 = scmp.lt.s32.totalorder %s627_s24, %s627_s24 }
  0x1e   :  { %p634_p0 = por %p633_p13, %p632_p12 }
  0x20   :  { %p635_p1 = pnand %p634_p0, %p628_p11 }
  0x22   :  { %638 = shalt.err (!%p635_p1)
}
  0x23   :  { %s717_s1 = smov 128   ;;  %s718_s25 = smov 8  }
  0x24   :  { %27 = dma.hbm_to_vmem [thread:$0]  %s881_s0, 256, %s22_s16, [#allocation3], %s717_s1, %s717_s1, %s718_s25  }
  0x25   :  { %s719_s28 = smov [#allocation7]   ;;  %s720_s30 = smov [#allocation8]  }
  0x26   :  { %s47_s29 = sshll.u32 %s719_s28, 4  ;;  %s61_s8 = sshll.u32 %s720_s30, 4  ;;  %s48_s29 = int_to_ptr.vmem [resolvable:$true] %s47_s29  ;;  %s794_s8 = int_to_ptr.vmem [resolvable:$true] %s61_s8 }
  0x27   :  { %s639_s13 = scalar_lea.hbm %s884_s3, 1024 }
  0x28   :  { %p640_p2 = scmp.ne.s32.totalorder %s884_s3, %s639_s13  ;;  %p643_p3 = scmp.lt.u32.totalorder %s639_s13, %s884_s3 }
  0x2a   :  { %p645_p4 = pnand %p643_p3, %p640_p2 }
  0x2c   :  { %648 = shalt.err (!%p645_p4)
}
  0x2d   :  { %s649_s0 = scalar_lea.vmem %s48_s29, 1024  ;;  %p654_p6 = scmp.lt.s32.totalorder %s48_s29, %s48_s29 }
  0x2e   :  { %p650_p5 = scmp.ne.s32.totalorder %s48_s29, %s649_s0  ;;  %p655_p7 = scmp.lt.s32.totalorder %s649_s0, %s649_s0 }
  0x30   :  { %p656_p8 = por %p655_p7, %p654_p6 }
  0x32   :  { %p657_p9 = pnand %p656_p8, %p650_p5 }
  0x34   :  { %660 = shalt.err (!%p657_p9)
}
  0x35   :  { %53 = dma.hbm_to_vmem [thread:$0]  %s884_s3, 1024, %s48_s29, [#allocation6], %s714_s11, %s714_s11, %s715_s12  }
  0x36   :  { %s661_s22 = scalar_lea.hbm %s886_s5, 1024 }
  0x37   :  { %p662_p10 = scmp.ne.s32.totalorder %s886_s5, %s661_s22  ;;  %p665_p11 = scmp.lt.u32.totalorder %s661_s22, %s886_s5 }
  0x39   :  { %p667_p12 = pnand %p665_p11, %p662_p10 }
  0x3b   :  { %670 = shalt.err (!%p667_p12)
}
  0x3c   :  { %s671_s28 = scalar_lea.vmem %s794_s8, 1024  ;;  %p676_p0 = scmp.lt.s32.totalorder %s794_s8, %s794_s8 }
  0x3d   :  { %p672_p13 = scmp.ne.s32.totalorder %s794_s8, %s671_s28  ;;  %p677_p1 = scmp.lt.s32.totalorder %s671_s28, %s671_s28 }
  0x3f   :  { %p678_p2 = por %p677_p1, %p676_p0 }
  0x41   :  { %p679_p3 = pnand %p678_p2, %p672_p13 }
  0x43   :  { %682 = shalt.err (!%p679_p3)
}
  0x44   :  { %67 = dma.hbm_to_vmem [thread:$0]  %s886_s5, 1024, %s794_s8, [#allocation9], %s714_s11, %s714_s11, %s715_s12  }
  0x45   :  { %705 = dma.done.wait [#allocation3], 256  }
  0x46   :  { %706 = vsyncadd [#allocation3], 4294967040 }
  0x47   :  { %707 = dma.done.wait [#allocation6], 1536  }
  0x48   :  { %708 = vsyncadd [#allocation6], 4294965760 }
  0x49   :  { %709 = dma.done.wait [#allocation9], 1024  }
  0x4a   :  { %710 = vsyncadd [#allocation9], 4294966272  ;;  %v721_v0 = vmov 0.0   ;;  %vm722_vm0 = vmmov 0   ;;  %v559_v1 = vld [vmem:[#allocation5] sm:$0xff]   ;;  %v560_v2 = vld [vmem:[#allocation5 + $0x8] sm:$0xff]  }
  0x4b   :  { %496 = vmatprep.subr.bf16.mxu0 %v721_v0  ;;  %504 = vmatprep.mubr.msk.bf16.mxu0 %vm722_vm0, %v721_v0  ;;  %v561_v3 = vld [vmem:[#allocation5 + $0x10] sm:$0xff]   ;;  %vm125_vm1 = vcmask 523264   ;;  %v562_v4 = vld [vmem:[#allocation5 + $0x18] sm:$0xff]   ;;  %v563_v8 = vld [vmem:[#allocation7] sm:$0xff]   ;;  %s723_s8 = smov [#allocation10]  }
  0x4c   :  { %508 = vmatprep.subr.bf16.mxu1 %v721_v0  ;;  %524 = vmatprep.mubr.msk.bf16.mxu1 %vm722_vm0, %v721_v0  ;;  %v83_v5 = vld [vmem:[#allocation2] sm:$0xff]  ;;  %v84_v6 = vld [vmem:[#allocation2 + $0x8] sm:$0xff]  ;;  %v564_v9 = vld [vmem:[#allocation7 + $0x8] sm:$0xff]   ;;  %s431_s9 = sshll.u32 %s723_s8, 4  ;;  %s432_s9 = int_to_ptr.vmem [resolvable:$true] %s431_s9 }
  0x4d   :  { %497 = vmatpush3.bf16.msra.mxu0 %v559_v1  ;;  %v85_v7 = vpack.c.bf16 %v84_v6, %v83_v5  ;;  %509 = vmatpush3.bf16.msra.mxu1 %v563_v8  ;;  %v565_v10 = vld [vmem:[#allocation7 + $0x10] sm:$0xff]   ;;  %v566_v11 = vld [vmem:[#allocation7 + $0x18] sm:$0xff]   ;;  %v567_v12 = vld [vmem:[#allocation7 + $0x20] sm:$0xff]   ;;  %s683_s10 = scalar_lea.vmem %s432_s9, 256  ;;  %p688_p5 = scmp.lt.s32.totalorder %s432_s9, %s432_s9 }
  0x4e   :  { %498 = vmatprep.subr.bf16.mxu0 %v721_v0  ;;  %510 = vmatprep.subr.bf16.mxu1 %v721_v0  ;;  %v568_v13 = vld [vmem:[#allocation7 + $0x28] sm:$0xff]   ;;  %v569_v14 = vld [vmem:[#allocation7 + $0x30] sm:$0xff]   ;;  %v570_v15 = vld [vmem:[#allocation7 + $0x38] sm:$0xff]   ;;  %p684_p4 = scmp.ne.s32.totalorder %s432_s9, %s683_s10  ;;  %p689_p6 = scmp.lt.s32.totalorder %s683_s10, %s683_s10 }
  0x4f   :  { %v445_v16 = vld [vmem:[%s883_s2] ss:$0 sm:$0xff]  ;;  %v571_v34 = vld [vmem:[#allocation8] sm:$0xff]   ;;  %v572_v35 = vld [vmem:[#allocation8 + $0x8] sm:$0xff]  }
  0x50   :  { %v573_v36 = vld [vmem:[#allocation8 + $0x10] sm:$0xff]   ;;  %v574_v37 = vld [vmem:[#allocation8 + $0x18] sm:$0xff]   ;;  %v575_v38 = vld [vmem:[#allocation8 + $0x20] sm:$0xff]   ;;  %p690_p7 = por %p689_p6, %p688_p5 }
  0x51   :  { %499 = vmatpush3.bf16.msra.mxu0 %v560_v2  ;;  %511 = vmatpush3.bf16.msra.mxu1 %v564_v9  ;;  %v576_v39 = vld [vmem:[#allocation8 + $0x28] sm:$0xff]   ;;  %v577_v40 = vld [vmem:[#allocation8 + $0x30] sm:$0xff]   ;;  %v578_v41 = vld [vmem:[#allocation8 + $0x38] sm:$0xff]  }
  0x52   :  { %500 = vmatprep.subr.bf16.mxu0 %v721_v0  ;;  %512 = vmatprep.subr.bf16.mxu1 %v721_v0  ;;  %v453_v42 = vld [vmem:[%s885_s4] ss:$0 sm:$0xff]  ;;  %p691_p8 = pnand %p690_p7, %p684_p4 }
  0x53   :  { %v464_v60 = vld [vmem:[%s887_s6] ss:$0 sm:$0xff] }
  0x55   :  { %501 = vmatpush3.bf16.msra.mxu0 %v561_v3  ;;  %513 = vmatpush3.bf16.msra.mxu1 %v565_v10 }
  0x56   :  { %502 = vmatprep.subr.bf16.mxu0 %v721_v0  ;;  %514 = vmatprep.subr.bf16.mxu1 %v721_v0 }
  0x59   :  { %503 = vmatpush3.bf16.msra.mxu0 %v562_v4  ;;  %515 = vmatpush3.bf16.msra.mxu1 %v566_v11 }
  0x5a   :  { %528 = vmatprep.subr.bf16.mxu0 %v721_v0  ;;  %516 = vmatprep.subr.bf16.mxu1 %v721_v0 }
  0x5c   :  { %505 = vmatmul.mubr.msk.bf16.vlgmr.msra.gmra.mrb[0].mxu0 %vm125_vm1, %v85_v7 }
  0x5d   :  { %544 = vmatprep.mubr.msk.bf16.mxu0 %vm722_vm0, %v721_v0  ;;  %517 = vmatpush3.bf16.msra.mxu1 %v567_v12 }
  0x5e   :  { %518 = vmatprep.subr.bf16.mxu1 %v721_v0  ;;  %529 = vmatpush3.bf16.msra.mxu0 %v571_v34 }
  0x5f   :  { %530 = vmatprep.subr.bf16.mxu0 %v721_v0 }
  0x61   :  { %519 = vmatpush3.bf16.msra.mxu1 %v568_v13 }
  0x62   :  { %520 = vmatprep.subr.bf16.mxu1 %v721_v0  ;;  %531 = vmatpush3.bf16.msra.mxu0 %v572_v35 }
  0x63   :  { %532 = vmatprep.subr.bf16.mxu0 %v721_v0 }
  0x65   :  { %521 = vmatpush3.bf16.msra.mxu1 %v569_v14 }
  0x66   :  { %522 = vmatprep.subr.bf16.mxu1 %v721_v0  ;;  %533 = vmatpush3.bf16.msra.mxu0 %v573_v36 }
  0x67   :  { %534 = vmatprep.subr.bf16.mxu0 %v721_v0 }
  0x69   :  { %523 = vmatpush3.bf16.msra.mxu1 %v570_v15 }
  0x6a   :  { %535 = vmatpush3.bf16.msra.mxu0 %v574_v37 }
  0x6b   :  { %536 = vmatprep.subr.bf16.mxu0 %v721_v0 }
  0x6e   :  { %537 = vmatpush3.bf16.msra.mxu0 %v575_v38 }
  0x6f   :  { %538 = vmatprep.subr.bf16.mxu0 %v721_v0 }
  0x72   :  { %539 = vmatpush3.bf16.msra.mxu0 %v576_v39 }
  0x73   :  { %540 = vmatprep.subr.bf16.mxu0 %v721_v0 }
  0x76   :  { %541 = vmatpush3.bf16.msra.mxu0 %v577_v40 }
  0x77   :  { %542 = vmatprep.subr.bf16.mxu0 %v721_v0 }
  0x7a   :  { %543 = vmatpush3.bf16.msra.mxu0 %v578_v41 }
 0x12f   :  { %v163_v17 = vpop.f32.mrb[0].mxu0 }
 0x130   :  { %v164_v18 = vadd.f32 %v445_v16, %v163_v17  ;;  %v506_v19 = vpop.f32.mrb[1].mxu0 }
 0x131   :  { %v166_v20 = vpop.f32.mrb[2].mxu0 }
 0x132   :  { %v451_v21 = vmul.f32 -1.442695, %v164_v18  ;;  %v167_v22 = vadd.f32 %v445_v16, %v166_v20  ;;  %v507_v23 = vpop.f32.mrb[3].mxu0 }
 0x134   :  { %579 = vpow2.f32 %v451_v21  ;;  %v452_v24 = vmul.f32 -1.442695, %v167_v22 }
 0x136   :  { %581 = vpow2.f32 %v452_v24 }
 0x13e   :  { %v580_v25 = vpop.eup %579 }
 0x13f   :  { %v176_v26 = vadd.f32 1.0, %v580_v25 }
 0x140   :  { %v582_v27 = vpop.eup %581 }
 0x141   :  { %583 = vrcp.f32 %v176_v26  ;;  %v177_v28 = vadd.f32 1.0, %v582_v27 }
 0x143   :  { %585 = vrcp.f32 %v177_v28 }
 0x14b   :  { %v584_v29 = vpop.eup %583 }
 0x14c   :  { %v182_v31 = vmul.f32 %v584_v29, %v164_v18 }
 0x14d   :  { %v586_v30 = vpop.eup %585 }
 0x14e   :  { %v183_v32 = vmul.f32 %v586_v30, %v167_v22 }
 0x150   :  { %v184_v33 = vpack.c.bf16 %v183_v32, %v182_v31 }
 0x152   :  { %525 = vmatmul.mubr.bf16.vlgmr.msra.gmra.mrb[0].mxu1 %v184_v33 }
 0x225   :  { %v290_v43 = vpop.f32.mrb[0].mxu1 }
 0x226   :  { %v291_v44 = vadd.f32 %v453_v42, %v290_v43  ;;  %v526_v45 = vpop.f32.mrb[1].mxu1 }
 0x227   :  { %v293_v46 = vpop.f32.mrb[2].mxu1 }
 0x228   :  { %v462_v47 = vmul.f32 -1.442695, %v291_v44  ;;  %v294_v48 = vadd.f32 %v453_v42, %v293_v46  ;;  %v527_v49 = vpop.f32.mrb[3].mxu1 }
 0x22a   :  { %587 = vpow2.f32 %v462_v47  ;;  %v463_v50 = vmul.f32 -1.442695, %v294_v48 }
 0x22c   :  { %589 = vpow2.f32 %v463_v50 }
 0x234   :  { %v588_v51 = vpop.eup %587 }
 0x235   :  { %v303_v52 = vadd.f32 1.0, %v588_v51 }
 0x236   :  { %v590_v53 = vpop.eup %589 }
 0x237   :  { %591 = vrcp.f32 %v303_v52  ;;  %v304_v54 = vadd.f32 1.0, %v590_v53 }
 0x239   :  { %593 = vrcp.f32 %v304_v54 }
 0x241   :  { %v592_v55 = vpop.eup %591 }
 0x242   :  { %v309_v57 = vmul.f32 %v592_v55, %v291_v44 }
 0x243   :  { %v594_v56 = vpop.eup %593 }
 0x244   :  { %v310_v58 = vmul.f32 %v594_v56, %v294_v48 }
 0x246   :  { %v311_v59 = vpack.c.bf16 %v310_v58, %v309_v57 }
 0x248   :  { %545 = vmatmul.mubr.bf16.vlgmr.msra.gmra.mrb[4].mxu0 %v311_v59 }
 0x31b   :  { %v417_v61 = vpop.f32.mrb[4].mxu0 }
 0x31c   :  { %v418_v62 = vadd.f32 %v464_v60, %v417_v61  ;;  %v546_v63 = vpop.f32.mrb[5].mxu0 }
 0x31d   :  { %v420_v0 = vpop.f32.mrb[6].mxu0 }
 0x31e   :  { %424 = vst [vmem:[#allocation10] sm:$0xff] %v418_v62  ;;  %v421_v1 = vadd.f32 %v464_v60, %v420_v0  ;;  %v547_v2 = vpop.f32.mrb[7].mxu0 }
 0x320   :  { %425 = vst [vmem:[#allocation10 + $0x8] sm:$0xff] %v421_v1 }
 0x321   :  { %694 = shalt.err (!%p691_p8)
}
 0x322   :  { %s695_s14 = scalar_lea.hbm %s888_s7, 256 }
 0x323   :  { %p696_p9 = scmp.ne.s32.totalorder %s888_s7, %s695_s14  ;;  %p699_p10 = scmp.lt.u32.totalorder %s695_s14, %s888_s7 }
 0x325   :  { %p701_p11 = pnand %p699_p10, %p696_p9 }
 0x327   :  { %704 = shalt.err (!%p701_p11)
}
 0x328   :  { %437 = dma.vmem_to_hbm [thread:$0]  %s432_s9, 256, %s888_s7, [#allocation4], %s717_s1, %s717_s1, %s718_s25  }
 0x329   :  { %711 = dma.done.wait [#allocation4], 256  }
 0x32a   :  { %712 = vsyncadd [#allocation4], 4294967040 }
 0x32b   :  { %441 = vsyncpa [#allocation3], 1 }
 0x32c   :  { %442 = vsyncpa [#allocation6], 1 }
 0x32d   :  { %443 = vsyncpa [#allocation9], 1 }
 0x32e   :  { %444 = vsyncpa [#allocation4], 1 }

</bundles_post_ra>
